<compile_context>
chip_gen: v6e
topology: v6e:2x2x1
jax: 0.10.0
libtpu: 0.0.40
codegen_flags: <defaults>
</compile_context>

<pallas_src>
import jax
import jax.numpy as jnp
import numpy as np
from jax.experimental import pallas as pl
from jax.experimental.pallas import tpu as pltpu


def _round_up(n, m):
    return ((n + m - 1) // m) * m


def global_model_kernel(batch_ref, x_ref, u_ref,
                        w1_ref, b1_ref, w2_ref, b2_ref, w3_ref, b3_ref,
                        out_ref,
                        seg_sum_ref, counts_ref, seg_max_ref):
    step = pl.program_id(0)
    B, F = seg_sum_ref.shape                 # graphs, node features
    tN = x_ref.shape[1]                      # node-tile width (lane axis)

    @pl.when(step == 0)
    def _init():
        seg_sum_ref[...] = jnp.zeros_like(seg_sum_ref)
        counts_ref[...] = jnp.zeros_like(counts_ref)
        seg_max_ref[...] = jnp.full_like(seg_max_ref, -jnp.inf)

    ids = batch_ref[...]                     # [1, tN] int32; padded entries carry id == B
    x_t = x_ref[...]                         # [F, tN] f32, nodes lane-dense

    # --- segment sum on the MXU (transposed-rhs dot, contraction over nodes) ---
    # Padded nodes (id == B) match no one-hot row -> contribute nothing.
    graph_iota = jax.lax.broadcasted_iota(jnp.int32, (B, tN), 0)
    onehot_f = (ids == graph_iota).astype(jnp.float32)                # [B, tN]
    # NOTE: Mosaic's default f32 matmul path keeps enough operand precision to
    # match jax.ops.segment_sum at these scales; pass precision=HIGHEST here if
    # exact parity is needed on very large graphs.
    seg_sum_ref[...] += jax.lax.dot_general(
        onehot_f, x_t, (((1,), (1,)), ((), ())),
        preferred_element_type=jnp.float32)                           # [B, F]
    counts_ref[...] += jnp.sum(onehot_f, axis=1, keepdims=True)       # [B, 1]

    # --- segment max: per-graph masked cross-lane reduction (B tiny & static) ---
    neg_inf = jnp.float32(-jnp.inf)
    for b in range(B):
        masked = jnp.where(ids == b, x_t, neg_inf)                    # [F, tN]
        tile_max = jnp.max(masked, axis=1, keepdims=True)             # [F, 1]
        seg_max_ref[:, b:b + 1] = jnp.maximum(seg_max_ref[:, b:b + 1], tile_max)

    # --- epilogue: finalize aggregations + tiny MLP (runs once, last step) ---
    @pl.when(step == pl.num_programs(0) - 1)
    def _finalize():
        counts = counts_ref[...]                                      # [B, 1]
        seg_mean = seg_sum_ref[...] / jnp.maximum(counts, 1.0)        # [B, F]
        seg_max = jnp.where(counts > 0.0,
                            jnp.transpose(seg_max_ref[...]), 0.0)     # [B, F]; empty graph -> 0
        feats = jnp.concatenate([u_ref[...], seg_mean, seg_max], axis=1)   # [B, G + 2F]

        h1 = jnp.dot(feats, w1_ref[...], preferred_element_type=jnp.float32) + b1_ref[...]
        h1 = jnp.maximum(h1, 0.0)
        h2 = jnp.dot(h1, w2_ref[...], preferred_element_type=jnp.float32) + b2_ref[...]
        h2 = jnp.maximum(h2, 0.0)
        y = jnp.dot(h2, w3_ref[...], preferred_element_type=jnp.float32) + b3_ref[...]
        out_ref[...] = y.astype(out_ref.dtype)


def global_model_forward(x, u, batch, params, *, tile_n=8192):
    """x: [N, F_node], u: [B, F_global], batch: [N] int32 (graph id per node)."""
    assert tile_n % 128 == 0, "tile_n must be a multiple of 128 (lane width)"
    N, F = x.shape
    B, G = u.shape
    Gout = params["w3"].shape[1]
    mf = params["w2"].shape[0]

    # Lane-dense output: pad the last Linear to 128 output lanes; slice afterwards.
    Gpad = _round_up(Gout, 128)
    w3p = jnp.zeros((params["w3"].shape[0], Gpad), jnp.float32).at[:, :Gout].set(params["w3"])
    b3p = jnp.zeros((1, Gpad), jnp.float32).at[:, :Gout].set(params["b3"])

    # Node-axis tiling with bounded tail padding: smallest 128-multiple tile
    # (<= tile_n) that covers N in the minimum number of grid steps.
    n128 = _round_up(N, 128)
    num_tiles = pl.cdiv(n128, tile_n)
    tN = _round_up(pl.cdiv(n128, num_tiles), 128)
    N_pad = tN * num_tiles

    # Single wrapper-side layout pass: transpose to [F, N] so the node axis is
    # lane-dense inside the kernel; the ragged-tail zero padding is folded into
    # the same copy.  Padded nodes get graph id == B so they match no graph and
    # contribute nothing to sum, counts, or max.
    x_t = jnp.transpose(x.astype(jnp.float32))                        # [F, N]
    if N_pad != N:
        x_t = jnp.pad(x_t, ((0, 0), (0, N_pad - N)))
    batch_p = jnp.full((1, N_pad), B, jnp.int32).at[0, :N].set(batch.astype(jnp.int32))

    grid_spec = pltpu.PrefetchScalarGridSpec(
        num_scalar_prefetch=0,
        grid=(num_tiles,),
        in_specs=[
            pl.BlockSpec((1, tN), lambda i: (0, i)),           # batch ids tile
            pl.BlockSpec((F, tN), lambda i: (0, i)),           # x^T tile (lane-dense nodes)
            pl.BlockSpec((B, G), lambda i: (0, 0)),            # u (resident)
            pl.BlockSpec(params["w1"].shape, lambda i: (0, 0)),
            pl.BlockSpec(params["b1"].shape, lambda i: (0, 0)),
            pl.BlockSpec(params["w2"].shape, lambda i: (0, 0)),
            pl.BlockSpec(params["b2"].shape, lambda i: (0, 0)),
            pl.BlockSpec(w3p.shape, lambda i: (0, 0)),
            pl.BlockSpec(b3p.shape, lambda i: (0, 0)),
        ],
        out_specs=pl.BlockSpec((B, Gpad), lambda i: (0, 0)),   # resident, written in last step
        scratch_shapes=[
            pltpu.VMEM((B, F), jnp.float32),    # seg_sum accumulator
            pltpu.VMEM((B, 1), jnp.float32),    # per-graph node counts
            pltpu.VMEM((F, B), jnp.float32),    # running seg_max (feature-major)
        ],
    )

    d_in = G + 2 * F
    cost = pl.CostEstimate(
        flops=int(2 * B * N_pad * F            # one-hot matmul (segment sum)
                  + B * N_pad * F              # masked-max path
                  + 2 * B * (d_in * mf + mf * mf + mf * Gpad)),
        transcendentals=0,
        bytes_accessed=int(N_pad * F * 4 + N_pad * 4 + B * (G + Gpad) * 4
                           + (d_in * mf + mf * mf + mf * Gpad) * 4),
    )

    out = pl.pallas_call(
        global_model_kernel,
        out_shape=jax.ShapeDtypeStruct((B, Gpad), jnp.float32),
        grid_spec=grid_spec,
        compiler_params=pltpu.CompilerParams(
            # Single streaming/reduction axis over node tiles -> 'arbitrary'
            # (resident scratch accumulators).
            dimension_semantics=("arbitrary",),
            # Double-buffered [F, tN] f32 tile at tN=8192 is ~0.5 MiB; well under
            # the smallest scoped budget (v7x: 32 MiB default / 64 MiB physical).
            vmem_limit_bytes=32 * 1024 * 1024,
        ),
        cost_estimate=cost,
    )(batch_p, x_t, u.astype(jnp.float32),
      params["w1"], params["b1"], params["w2"], params["b2"], w3p, b3p)

    return out[:, :Gout]


def make_params(node_in, global_in, global_out, message_feats=32, key=None):
    ks = jax.random.split(key, 6)
    d_in = 2 * node_in + global_in

    def lin(kw, kb, fan_in, fan_out):
        bound = 1.0 / np.sqrt(fan_in)
        w = jax.random.uniform(kw, (fan_in, fan_out), jnp.float32, -bound, bound)
        b = jax.random.uniform(kb, (1, fan_out), jnp.float32, -bound, bound)
        return w, b

    w1, b1 = lin(ks[0], ks[1], d_in, message_feats)
    w2, b2 = lin(ks[2], ks[3], message_feats, message_feats)
    w3, b3 = lin(ks[4], ks[5], message_feats, global_out)
    return dict(w1=w1, b1=b1, w2=w2, b2=b2, w3=w3, b3=b3)


def reference_forward(x, u, batch, params):
    """Pure-JAX reference for correctness checking."""
    B = u.shape[0]
    seg_sum = jax.ops.segment_sum(x, batch, num_segments=B)
    counts = jax.ops.segment_sum(jnp.ones((x.shape[0], 1)), batch, num_segments=B)
    seg_mean = seg_sum / jnp.maximum(counts, 1.0)
    seg_max = jax.ops.segment_max(x, batch, num_segments=B)
    seg_max = jnp.where(counts > 0, seg_max, 0.0)
    feats = jnp.concatenate([u, seg_mean, seg_max], axis=1)
    h1 = jnp.maximum(feats @ params["w1"] + params["b1"], 0.0)
    h2 = jnp.maximum(h1 @ params["w2"] + params["b2"], 0.0)
    return h2 @ params["w3"] + params["b3"]


if __name__ == "__main__":
    key = jax.random.PRNGKey(0)
    k_x, k_u, k_p = jax.random.split(key, 3)

    # Small synthetic graph batch: 4 graphs with uneven sizes, 300 nodes total.
    # tile_n=128 -> node axis padded to 384 -> 3 grid steps (exercises the
    # accumulator path and the ragged-tail padding).
    B = 4
    graph_sizes = [90, 80, 70, 60]
    N = sum(graph_sizes)
    node_in, global_in, global_out, message_feats = 8, 4, 6, 32

    x = jax.random.normal(k_x, (N, node_in), jnp.float32)
    u = jax.random.normal(k_u, (B, global_in), jnp.float32)
    batch = jnp.concatenate(
        [jnp.full((s,), g, jnp.int32) for g, s in enumerate(graph_sizes)])
    params = make_params(node_in, global_in, global_out, message_feats, key=k_p)

    # edge_index / edge_attr are unused by GlobalModel.forward -> omitted.
    # TODO(synk): Dropout is inference-mode identity (no RNG path in the kernel).
    out = global_model_forward(x, u, batch, params, tile_n=128)
    out = jax.block_until_ready(out)

    ref = reference_forward(x, u, batch, params)
    np.testing.assert_allclose(np.asarray(out), np.asarray(ref), rtol=1e-4, atol=1e-4)
    print("KERNEL_OK")
</pallas_src>

<mosaic_0001>
module attributes {stable_mosaic.version = 11 : i64} {
  func.func @global_model_kernel(%arg0: i32, %arg1: memref<1x128xi32, #tpu.memory_space<vmem>>, %arg2: memref<8x128xf32, #tpu.memory_space<vmem>>, %arg3: memref<4x4xf32, #tpu.memory_space<vmem>>, %arg4: memref<20x32xf32, #tpu.memory_space<vmem>>, %arg5: memref<1x32xf32, #tpu.memory_space<vmem>>, %arg6: memref<32x32xf32, #tpu.memory_space<vmem>>, %arg7: memref<1x32xf32, #tpu.memory_space<vmem>>, %arg8: memref<32x128xf32, #tpu.memory_space<vmem>>, %arg9: memref<1x128xf32, #tpu.memory_space<vmem>>, %arg10: memref<4x128xf32, #tpu.memory_space<vmem>>, %arg11: memref<4x8xf32, #tpu.memory_space<vmem>>, %arg12: memref<4x1xf32, #tpu.memory_space<vmem>>, %arg13: memref<8x4xf32, #tpu.memory_space<vmem>>) attributes {dimension_semantics = [#tpu.dimension_semantics<arbitrary>], iteration_bounds = array<i64: 3>, scalar_prefetch = 0 : i64, scratch_operands = 3 : i64, tpu.core_type = #tpu.core_type<tc>, window_params = [{transform_indices = @transform_0, window_bounds = array<i64: 1, 128>}, {transform_indices = @transform_1, window_bounds = array<i64: 8, 128>}, {pipeline_mode = #tpu.pipeline_mode<synchronous>, transform_indices = @transform_2, window_bounds = array<i64: 4, 4>}, {pipeline_mode = #tpu.pipeline_mode<synchronous>, transform_indices = @transform_3, window_bounds = array<i64: 20, 32>}, {pipeline_mode = #tpu.pipeline_mode<synchronous>, transform_indices = @transform_4, window_bounds = array<i64: 1, 32>}, {pipeline_mode = #tpu.pipeline_mode<synchronous>, transform_indices = @transform_5, window_bounds = array<i64: 32, 32>}, {pipeline_mode = #tpu.pipeline_mode<synchronous>, transform_indices = @transform_6, window_bounds = array<i64: 1, 32>}, {pipeline_mode = #tpu.pipeline_mode<synchronous>, transform_indices = @transform_7, window_bounds = array<i64: 32, 128>}, {pipeline_mode = #tpu.pipeline_mode<synchronous>, transform_indices = @transform_8, window_bounds = array<i64: 1, 128>}, {pipeline_mode = #tpu.pipeline_mode<synchronous>, transform_indices = @transform_9, window_bounds = array<i64: 4, 128>}]} {
    %c0_i32 = arith.constant 0 : i32
    %0 = arith.cmpi eq, %arg0, %c0_i32 : i32
    %1 = arith.extui %0 : i1 to i32
    %c0_i32_0 = arith.constant 0 : i32
    %2 = arith.cmpi ne, %1, %c0_i32_0 : i32
    scf.if %2 {
      %cst_37 = arith.constant 0.000000e+00 : f32
      %66 = vector.broadcast %cst_37 : f32 to vector<4x8xf32>
      %c0_38 = arith.constant 0 : index
      %c0_39 = arith.constant 0 : index
      %67 = vector.load %arg11[%c0_38, %c0_39] : memref<4x8xf32, #tpu.memory_space<vmem>>, vector<4x8xf32>
      tpu.vector_store %arg11[%c0_38, %c0_39], %66 {strides = array<i32>} : memref<4x8xf32, #tpu.memory_space<vmem>>, vector<4x8xf32>,
      %cst_40 = arith.constant 0.000000e+00 : f32
      %68 = vector.broadcast %cst_40 : f32 to vector<4x1xf32>
      %c0_41 = arith.constant 0 : index
      %c0_42 = arith.constant 0 : index
      %69 = vector.load %arg12[%c0_41, %c0_42] : memref<4x1xf32, #tpu.memory_space<vmem>>, vector<4x1xf32>
      tpu.vector_store %arg12[%c0_41, %c0_42], %68 {strides = array<i32>} : memref<4x1xf32, #tpu.memory_space<vmem>>, vector<4x1xf32>,
      %cst_43 = arith.constant 0xFF800000 : f32
      %70 = vector.broadcast %cst_43 : f32 to vector<8x4xf32>
      %c0_44 = arith.constant 0 : index
      %c0_45 = arith.constant 0 : index
      %71 = vector.load %arg13[%c0_44, %c0_45] : memref<8x4xf32, #tpu.memory_space<vmem>>, vector<8x4xf32>
      tpu.vector_store %arg13[%c0_44, %c0_45], %70 {strides = array<i32>} : memref<8x4xf32, #tpu.memory_space<vmem>>, vector<8x4xf32>,
    } else {
    }
    %c0 = arith.constant 0 : index
    %c0_1 = arith.constant 0 : index
    %3 = vector.load %arg1[%c0, %c0_1] : memref<1x128xi32, #tpu.memory_space<vmem>>, vector<1x128xi32>
    %c0_2 = arith.constant 0 : index
    %c0_3 = arith.constant 0 : index
    %4 = vector.load %arg2[%c0_2, %c0_3] : memref<8x128xf32, #tpu.memory_space<vmem>>, vector<8x128xf32>
    %5 = tpu.iota {dimensions = array<i32: 0>} : vector<4x128xi32>
    %6 = vector.broadcast %3 : vector<1x128xi32> to vector<4x128xi32>
    %7 = arith.cmpi eq, %6, %5 : vector<4x128xi32>
    %8 = arith.extui %7 : vector<4x128xi1> to vector<4x128xi32>
    %9 = arith.sitofp %8 : vector<4x128xi32> to vector<4x128xf32>
    %c0_4 = arith.constant 0 : index
    %c0_5 = arith.constant 0 : index
    %10 = vector.load %arg11[%c0_4, %c0_5] : memref<4x8xf32, #tpu.memory_space<vmem>>, vector<4x8xf32>
    %cst = arith.constant dense<0.000000e+00> : vector<4x8xf32>
    %11 = tpu.matmul %9, %4, %cst {dimension_numbers = #tpu.dot_dimension_numbers<[1], [1], [0], [0], [0, 0, 1, 0], [], []>} : vector<4x128xf32>, vector<8x128xf32>, vector<4x8xf32> -> vector<4x8xf32>
    %12 = arith.addf %10, %11 : vector<4x8xf32>
    %c0_6 = arith.constant 0 : index
    %c0_7 = arith.constant 0 : index
    %13 = vector.load %arg11[%c0_6, %c0_7] : memref<4x8xf32, #tpu.memory_space<vmem>>, vector<4x8xf32>
    tpu.vector_store %arg11[%c0_6, %c0_7], %12 {strides = array<i32>} : memref<4x8xf32, #tpu.memory_space<vmem>>, vector<4x8xf32>,
    %c0_8 = arith.constant 0 : index
    %c0_9 = arith.constant 0 : index
    %14 = vector.load %arg12[%c0_8, %c0_9] : memref<4x1xf32, #tpu.memory_space<vmem>>, vector<4x1xf32>
    %cst_10 = arith.constant dense<0.000000e+00> : vector<4xf32>
    %15 = vector.multi_reduction <add>, %9, %cst_10 [1] : vector<4x128xf32> to vector<4xf32>
    %16 = vector.shape_cast %15 : vector<4xf32> to vector<4x1xf32>
    %17 = arith.addf %14, %16 : vector<4x1xf32>
    %c0_11 = arith.constant 0 : index
    %c0_12 = arith.constant 0 : index
    %18 = vector.load %arg12[%c0_11, %c0_12] : memref<4x1xf32, #tpu.memory_space<vmem>>, vector<4x1xf32>
    tpu.vector_store %arg12[%c0_11, %c0_12], %17 {strides = array<i32>} : memref<4x1xf32, #tpu.memory_space<vmem>>, vector<4x1xf32>,
    %c0_i32_13 = arith.constant 0 : i32
    %19 = vector.broadcast %c0_i32_13 : i32 to vector<1x128xi32>
    %20 = arith.cmpi eq, %3, %19 : vector<1x128xi32>
    %cst_14 = arith.constant 0xFF800000 : f32
    %21 = vector.shape_cast %20 : vector<1x128xi1> to vector<1x128xi1>
    %22 = vector.broadcast %21 : vector<1x128xi1> to vector<8x128xi1>
    %23 = vector.broadcast %cst_14 : f32 to vector<8x128xf32>
    %24 = arith.select %22, %4, %23 : vector<8x128xi1>, vector<8x128xf32>
    %cst_15 = arith.constant dense<0xFF800000> : vector<8xf32>
    %25 = vector.multi_reduction <maximumf>, %24, %cst_15 [1] : vector<8x128xf32> to vector<8xf32>
    %26 = vector.shape_cast %25 : vector<8xf32> to vector<8x1xf32>
    %c0_16 = arith.constant 0 : index
    %c0_17 = arith.constant 0 : index
    %27 = vector.load %arg13[%c0_16, %c0_17] : memref<8x4xf32, #tpu.memory_space<vmem>>, vector<8x1xf32>
    %28 = arith.maximumf %27, %26 : vector<8x1xf32>
    %c0_18 = arith.constant 0 : index
    %c0_19 = arith.constant 0 : index
    %29 = vector.load %arg13[%c0_18, %c0_19] : memref<8x4xf32, #tpu.memory_space<vmem>>, vector<8x1xf32>
    tpu.vector_store %arg13[%c0_18, %c0_19], %28 {strides = array<i32>} : memref<8x4xf32, #tpu.memory_space<vmem>>, vector<8x1xf32>,
    %c1_i32 = arith.constant 1 : i32
    %30 = vector.broadcast %c1_i32 : i32 to vector<1x128xi32>
    %31 = arith.cmpi eq, %3, %30 : vector<1x128xi32>
    %cst_20 = arith.constant 0xFF800000 : f32
    %32 = vector.shape_cast %31 : vector<1x128xi1> to vector<1x128xi1>
    %33 = vector.broadcast %32 : vector<1x128xi1> to vector<8x128xi1>
    %34 = vector.broadcast %cst_20 : f32 to vector<8x128xf32>
    %35 = arith.select %33, %4, %34 : vector<8x128xi1>, vector<8x128xf32>
    %cst_21 = arith.constant dense<0xFF800000> : vector<8xf32>
    %36 = vector.multi_reduction <maximumf>, %35, %cst_21 [1] : vector<8x128xf32> to vector<8xf32>
    %37 = vector.shape_cast %36 : vector<8xf32> to vector<8x1xf32>
    %c0_22 = arith.constant 0 : index
    %c1 = arith.constant 1 : index
    %38 = vector.load %arg13[%c0_22, %c1] : memref<8x4xf32, #tpu.memory_space<vmem>>, vector<8x1xf32>
    %39 = arith.maximumf %38, %37 : vector<8x1xf32>
    %c0_23 = arith.constant 0 : index
    %c1_24 = arith.constant 1 : index
    %40 = vector.load %arg13[%c0_23, %c1_24] : memref<8x4xf32, #tpu.memory_space<vmem>>, vector<8x1xf32>
    tpu.vector_store %arg13[%c0_23, %c1_24], %39 {strides = array<i32>} : memref<8x4xf32, #tpu.memory_space<vmem>>, vector<8x1xf32>,
    %c2_i32 = arith.constant 2 : i32
    %41 = vector.broadcast %c2_i32 : i32 to vector<1x128xi32>
    %42 = arith.cmpi eq, %3, %41 : vector<1x128xi32>
    %cst_25 = arith.constant 0xFF800000 : f32
    %43 = vector.shape_cast %42 : vector<1x128xi1> to vector<1x128xi1>
    %44 = vector.broadcast %43 : vector<1x128xi1> to vector<8x128xi1>
    %45 = vector.broadcast %cst_25 : f32 to vector<8x128xf32>
    %46 = arith.select %44, %4, %45 : vector<8x128xi1>, vector<8x128xf32>
    %cst_26 = arith.constant dense<0xFF800000> : vector<8xf32>
    %47 = vector.multi_reduction <maximumf>, %46, %cst_26 [1] : vector<8x128xf32> to vector<8xf32>
    %48 = vector.shape_cast %47 : vector<8xf32> to vector<8x1xf32>
    %c0_27 = arith.constant 0 : index
    %c2 = arith.constant 2 : index
    %49 = vector.load %arg13[%c0_27, %c2] : memref<8x4xf32, #tpu.memory_space<vmem>>, vector<8x1xf32>
    %50 = arith.maximumf %49, %48 : vector<8x1xf32>
    %c0_28 = arith.constant 0 : index
    %c2_29 = arith.constant 2 : index
    %51 = vector.load %arg13[%c0_28, %c2_29] : memref<8x4xf32, #tpu.memory_space<vmem>>, vector<8x1xf32>
    tpu.vector_store %arg13[%c0_28, %c2_29], %50 {strides = array<i32>} : memref<8x4xf32, #tpu.memory_space<vmem>>, vector<8x1xf32>,
    %c3_i32 = arith.constant 3 : i32
    %52 = vector.broadcast %c3_i32 : i32 to vector<1x128xi32>
    %53 = arith.cmpi eq, %3, %52 : vector<1x128xi32>
    %cst_30 = arith.constant 0xFF800000 : f32
    %54 = vector.shape_cast %53 : vector<1x128xi1> to vector<1x128xi1>
    %55 = vector.broadcast %54 : vector<1x128xi1> to vector<8x128xi1>
    %56 = vector.broadcast %cst_30 : f32 to vector<8x128xf32>
    %57 = arith.select %55, %4, %56 : vector<8x128xi1>, vector<8x128xf32>
    %cst_31 = arith.constant dense<0xFF800000> : vector<8xf32>
    %58 = vector.multi_reduction <maximumf>, %57, %cst_31 [1] : vector<8x128xf32> to vector<8xf32>
    %59 = vector.shape_cast %58 : vector<8xf32> to vector<8x1xf32>
    %c0_32 = arith.constant 0 : index
    %c3 = arith.constant 3 : index
    %60 = vector.load %arg13[%c0_32, %c3] : memref<8x4xf32, #tpu.memory_space<vmem>>, vector<8x1xf32>
    %61 = arith.maximumf %60, %59 : vector<8x1xf32>
    %c0_33 = arith.constant 0 : index
    %c3_34 = arith.constant 3 : index
    %62 = vector.load %arg13[%c0_33, %c3_34] : memref<8x4xf32, #tpu.memory_space<vmem>>, vector<8x1xf32>
    tpu.vector_store %arg13[%c0_33, %c3_34], %61 {strides = array<i32>} : memref<8x4xf32, #tpu.memory_space<vmem>>, vector<8x1xf32>,
    %c2_i32_35 = arith.constant 2 : i32
    %63 = arith.cmpi eq, %arg0, %c2_i32_35 : i32
    %64 = arith.extui %63 : i1 to i32
    %c0_i32_36 = arith.constant 0 : i32
    %65 = arith.cmpi ne, %64, %c0_i32_36 : i32
    scf.if %65 {
      %c0_37 = arith.constant 0 : index
      %c0_38 = arith.constant 0 : index
      %66 = vector.load %arg12[%c0_37, %c0_38] : memref<4x1xf32, #tpu.memory_space<vmem>>, vector<4x1xf32>
      %c0_39 = arith.constant 0 : index
      %c0_40 = arith.constant 0 : index
      %67 = vector.load %arg11[%c0_39, %c0_40] : memref<4x8xf32, #tpu.memory_space<vmem>>, vector<4x8xf32>
      %cst_41 = arith.constant 1.000000e+00 : f32
      %68 = vector.broadcast %cst_41 : f32 to vector<4x1xf32>
      %69 = arith.maximumf %66, %68 : vector<4x1xf32>
      %70 = vector.broadcast %69 : vector<4x1xf32> to vector<4x8xf32>
      %71 = arith.divf %67, %70 : vector<4x8xf32>
      %cst_42 = arith.constant 0.000000e+00 : f32
      %72 = vector.broadcast %cst_42 : f32 to vector<4x1xf32>
      %73 = arith.cmpf ogt, %66, %72 : vector<4x1xf32>
      %c0_43 = arith.constant 0 : index
      %c0_44 = arith.constant 0 : index
      %74 = vector.load %arg13[%c0_43, %c0_44] : memref<8x4xf32, #tpu.memory_space<vmem>>, vector<8x4xf32>
      %75 = tpu.transpose %74, [1, 0] : vector<8x4xf32> -> vector<4x8xf32>
      %cst_45 = arith.constant 0.000000e+00 : f32
      %76 = vector.shape_cast %73 : vector<4x1xi1> to vector<4x1xi1>
      %77 = vector.broadcast %76 : vector<4x1xi1> to vector<4x8xi1>
      %78 = vector.broadcast %cst_45 : f32 to vector<4x8xf32>
      %79 = arith.select %77, %75, %78 : vector<4x8xi1>, vector<4x8xf32>
      %c0_46 = arith.constant 0 : index
      %c0_47 = arith.constant 0 : index
      %80 = vector.load %arg3[%c0_46, %c0_47] : memref<4x4xf32, #tpu.memory_space<vmem>>, vector<4x4xf32>
      %81 = tpu.concatenate %80, %71, %79 in 1 : vector<4x4xf32>, vector<4x8xf32>, vector<4x8xf32> -> vector<4x20xf32>
      %c0_48 = arith.constant 0 : index
      %c0_49 = arith.constant 0 : index
      %82 = vector.load %arg4[%c0_48, %c0_49] : memref<20x32xf32, #tpu.memory_space<vmem>>, vector<20x32xf32>
      %cst_50 = arith.constant dense<0.000000e+00> : vector<4x32xf32>
      %83 = tpu.matmul %81, %82, %cst_50 {dimension_numbers = #tpu.dot_dimension_numbers<[1], [0], [0], [1], [0, 0, 1, 1], [], []>} : vector<4x20xf32>, vector<20x32xf32>, vector<4x32xf32> -> vector<4x32xf32>
      %c0_51 = arith.constant 0 : index
      %c0_52 = arith.constant 0 : index
      %84 = vector.load %arg5[%c0_51, %c0_52] : memref<1x32xf32, #tpu.memory_space<vmem>>, vector<1x32xf32>
      %85 = vector.broadcast %84 : vector<1x32xf32> to vector<4x32xf32>
      %86 = arith.addf %83, %85 : vector<4x32xf32>
      %cst_53 = arith.constant 0.000000e+00 : f32
      %87 = vector.broadcast %cst_53 : f32 to vector<4x32xf32>
      %88 = arith.maximumf %86, %87 : vector<4x32xf32>
      %c0_54 = arith.constant 0 : index
      %c0_55 = arith.constant 0 : index
      %89 = vector.load %arg6[%c0_54, %c0_55] : memref<32x32xf32, #tpu.memory_space<vmem>>, vector<32x32xf32>
      %cst_56 = arith.constant dense<0.000000e+00> : vector<4x32xf32>
      %90 = tpu.matmul %88, %89, %cst_56 {dimension_numbers = #tpu.dot_dimension_numbers<[1], [0], [0], [1], [0, 0, 1, 1], [], []>} : vector<4x32xf32>, vector<32x32xf32>, vector<4x32xf32> -> vector<4x32xf32>
      %c0_57 = arith.constant 0 : index
      %c0_58 = arith.constant 0 : index
      %91 = vector.load %arg7[%c0_57, %c0_58] : memref<1x32xf32, #tpu.memory_space<vmem>>, vector<1x32xf32>
      %92 = vector.broadcast %91 : vector<1x32xf32> to vector<4x32xf32>
      %93 = arith.addf %90, %92 : vector<4x32xf32>
      %cst_59 = arith.constant 0.000000e+00 : f32
      %94 = vector.broadcast %cst_59 : f32 to vector<4x32xf32>
      %95 = arith.maximumf %93, %94 : vector<4x32xf32>
      %c0_60 = arith.constant 0 : index
      %c0_61 = arith.constant 0 : index
      %96 = vector.load %arg8[%c0_60, %c0_61] : memref<32x128xf32, #tpu.memory_space<vmem>>, vector<32x128xf32>
      %cst_62 = arith.constant dense<0.000000e+00> : vector<4x128xf32>
      %97 = tpu.matmul %95, %96, %cst_62 {dimension_numbers = #tpu.dot_dimension_numbers<[1], [0], [0], [1], [0, 0, 1, 1], [], []>} : vector<4x32xf32>, vector<32x128xf32>, vector<4x128xf32> -> vector<4x128xf32>
      %c0_63 = arith.constant 0 : index
      %c0_64 = arith.constant 0 : index
      %98 = vector.load %arg9[%c0_63, %c0_64] : memref<1x128xf32, #tpu.memory_space<vmem>>, vector<1x128xf32>
      %99 = vector.broadcast %98 : vector<1x128xf32> to vector<4x128xf32>
      %100 = arith.addf %97, %99 : vector<4x128xf32>
      %c0_65 = arith.constant 0 : index
      %c0_66 = arith.constant 0 : index
      %101 = vector.load %arg10[%c0_65, %c0_66] : memref<4x128xf32, #tpu.memory_space<vmem>>, vector<4x128xf32>
      tpu.vector_store %arg10[%c0_65, %c0_66], %100 {strides = array<i32>} : memref<4x128xf32, #tpu.memory_space<vmem>>, vector<4x128xf32>,
    } else {
    }
    return
  }
  func.func @transform_0(%arg0: i32) -> (i32, i32) {
    %c0_i32 = arith.constant 0 : i32
    %c0_i32_0 = arith.constant 0 : i32
    return %c0_i32, %arg0 : i32, i32
  }
  func.func @transform_1(%arg0: i32) -> (i32, i32) {
    %c0_i32 = arith.constant 0 : i32
    %c0_i32_0 = arith.constant 0 : i32
    return %c0_i32, %arg0 : i32, i32
  }
  func.func @transform_2(%arg0: i32) -> (i32, i32) {
    %c0_i32 = arith.constant 0 : i32
    %c0_i32_0 = arith.constant 0 : i32
    %c0_i32_1 = arith.constant 0 : i32
    return %c0_i32, %c0_i32_0 : i32, i32
  }
  func.func @transform_3(%arg0: i32) -> (i32, i32) {
    %c0_i32 = arith.constant 0 : i32
    %c0_i32_0 = arith.constant 0 : i32
    %c0_i32_1 = arith.constant 0 : i32
    return %c0_i32, %c0_i32_0 : i32, i32
  }
  func.func @transform_4(%arg0: i32) -> (i32, i32) {
    %c0_i32 = arith.constant 0 : i32
    %c0_i32_0 = arith.constant 0 : i32
    %c0_i32_1 = arith.constant 0 : i32
    return %c0_i32, %c0_i32_0 : i32, i32
  }
  func.func @transform_5(%arg0: i32) -> (i32, i32) {
    %c0_i32 = arith.constant 0 : i32
    %c0_i32_0 = arith.constant 0 : i32
    %c0_i32_1 = arith.constant 0 : i32
    return %c0_i32, %c0_i32_0 : i32, i32
  }
  func.func @transform_6(%arg0: i32) -> (i32, i32) {
    %c0_i32 = arith.constant 0 : i32
    %c0_i32_0 = arith.constant 0 : i32
    %c0_i32_1 = arith.constant 0 : i32
    return %c0_i32, %c0_i32_0 : i32, i32
  }
  func.func @transform_7(%arg0: i32) -> (i32, i32) {
    %c0_i32 = arith.constant 0 : i32
    %c0_i32_0 = arith.constant 0 : i32
    %c0_i32_1 = arith.constant 0 : i32
    return %c0_i32, %c0_i32_0 : i32, i32
  }
  func.func @transform_8(%arg0: i32) -> (i32, i32) {
    %c0_i32 = arith.constant 0 : i32
    %c0_i32_0 = arith.constant 0 : i32
    %c0_i32_1 = arith.constant 0 : i32
    return %c0_i32, %c0_i32_0 : i32, i32
  }
  func.func @transform_9(%arg0: i32) -> (i32, i32) {
    %c0_i32 = arith.constant 0 : i32
    %c0_i32_0 = arith.constant 0 : i32
    %c0_i32_1 = arith.constant 0 : i32
    return %c0_i32, %c0_i32_0 : i32, i32
  }
}

</mosaic_0001>

<bundles_post_ra>
// kernel: tpu_custom_call.1
= control target key start
LH: loop header
LB: loop body
LE: loop exit
PB: predicated region body
PF: predicated region fallthrough
CT: control target
= control target key end

     0   :  { %s1774_s0 = inlined_call_operand.hbm [shape: s32[1,384], index: 0, kind: input, shape index: {}]   ;;  %s1775_s1 = inlined_call_operand.hbm [shape: f32[8,384], index: 1, kind: input, shape index: {}]   ;;  %s1776_s2 = inlined_call_operand.hbm [shape: f32[4,4], index: 2, kind: input, shape index: {}]   ;;  %s1777_s3 = inlined_call_operand.hbm [shape: f32[20,32], index: 3, kind: input, shape index: {}]   ;;  %s1778_s4 = inlined_call_operand.vmem [shape: f32[1,32], index: 4, kind: input, shape index: {}]   ;;  %s1779_s5 = inlined_call_operand.hbm [shape: f32[32,32], index: 5, kind: input, shape index: {}]   ;;  %s1780_s6 = inlined_call_operand.vmem [shape: f32[1,32], index: 6, kind: input, shape index: {}]   ;;  %s1781_s7 = inlined_call_operand.hbm [shape: f32[32,128], index: 7, kind: input, shape index: {}]   ;;  %s1782_s8 = inlined_call_operand.vmem [shape: f32[1,128], index: 8, kind: input, shape index: {}]   ;;  %s1783_s9 = inlined_call_operand.hbm [shape: f32[4,128], index: 9, kind: output, shape index: {}]  }
   0x1   :  { %1787 = sst [smem:[#allocation23_spill]] %s1774_s0 }
   0x2   :  { %1788 = sst [smem:[#allocation24_spill]] %s1776_s2 }
   0x3   :  { %14 = vsyncpa [#allocation6], 0 }
   0x4   :  { %16 = vsyncpa [#allocation6 + $0x1], 0 }
   0x5   :  { %17 = vsyncpa [#allocation9], 0 }
   0x6   :  { %19 = vsyncpa [#allocation9 + $0x1], 0 }
   0x7   :  { %20 = vsyncpa [#allocation12], 0 }
   0x8   :  { %21 = vsyncpa [#allocation15], 0 }
   0x9   :  { %22 = vsyncpa [#allocation7], 0  ;;  %s1527_s30 = smov 0   ;;  %s1529_s10 = smov 0  }
   0xa   :  { %s1531_s11 = smov 0   ;;  %s1533_s12 = smov 0  }
   0xb LB: > { %s1457_s13 = smov [#allocation10]   ;;  %s1548_s15 = sadd.s32 4294967295, %s1455_s12   ;;  %s1455_s12 = sphi %s1533_s12, %s1809_s12   ;;  %s1451_s11 = sphi %s1531_s11, %s1808_s11   ;;  %s1447_s10 = sphi %s1529_s10, %s1807_s10   ;;  %s1443_s30 = sphi %s1527_s30, %s1806_s30  }
   0xc   : > { %s266_s14 = sshll.u32 %s1457_s13, 4  ;;  %p1027_p0 = scmp.ge.s32.totalorder %s1455_s12, 1  ;;  %s267_s14 = int_to_ptr.vmem [resolvable:$true] %s266_s14 }
   0xd   : > { %p1784_p1 = scmp.eq.s32.totalorder %s1548_s15, 0  ;;  %p253_p2 = scmp.lt.s32.totalorder %s1455_s12, 4 }
   0xe   : > { %s1458_s17 = smov [#allocation11]   ;;  %s1459_s20 = smov [#allocation13]  }
   0xf   : > { %p1554_p4 = pnand %p1027_p0, %p253_p2  ;;  %s276_s18 = sshll.u32 %s1458_s17, 4  ;;  %s1560_s18 = int_to_ptr.vmem [resolvable:$true] %s276_s18 }
  0x10   : > { %s292_s21 = sshll.u32 %s1459_s20, 4  ;;  %s1228_s22 = scalar_lea.vmem %s267_s14, 64  ;;  %s1568_s21 = int_to_ptr.vmem [resolvable:$true] %s292_s21 }
  0x11   : > { %s1789_s16 = scalar_select %p1554_p4, 1, 0 }
  0x12   : > { %p1133_p5 = pneg %p1554_p4  ;;  %p1229_p8 = scmp.ne.s32.totalorder %s267_s14, %s1228_s22 }
  0x13   : > { %p1236_p11 = scmp.lt.s32.totalorder %s267_s14, %s267_s14  ;;  %p1237_p12 = scmp.lt.s32.totalorder %s1228_s22, %s1228_s22 }
  0x14   : > { %p1564_p6 = pnand %p1133_p5, %p1784_p1 }
  0x15   : > { %p1238_p13 = por %p1237_p12, %p1236_p11 }
  0x16   : > { %p1219_p7 = pneg %p1564_p6 }
  0x18   : > { %p1231_p9 = pnand %p1229_p8, %p1219_p7 }
  0x1a   : > { %p1232_p10 = pneg %p1231_p9 }
  0x1c   : > { %p1239_p0 = pnand %p1238_p13, %p1232_p10 }
  0x1e   : > { %1242 = shalt.err (!%p1239_p0)
}
  0x1f   : > { %s1791_s2 = sld [smem:[#allocation24_spill]]  ;;  %s1254_s25 = scalar_lea.vmem %s1560_s18, 384 }
  0x20   : > { %p1255_p2 = scmp.ne.s32.totalorder %s1560_s18, %s1254_s25  ;;  %p1262_p9 = scmp.lt.s32.totalorder %s1560_s18, %s1560_s18 }
  0x21   : > { %p1263_p10 = scmp.lt.s32.totalorder %s1254_s25, %s1254_s25 }
  0x22   : > { %p1257_p5 = pnand %p1255_p2, %p1219_p7 }
  0x23   : > { %p1264_p11 = por %p1263_p10, %p1262_p9 }
  0x24   : > { %p1258_p8 = pneg %p1257_p5 }
  0x25   : > { %1136 = dma.hbm_to_vmem [thread:$0]  (!%p1564_p6), %s1791_s2, 64, %s267_s14, [#allocation9]  }
  0x26   : > { %p1265_p12 = pnand %p1264_p11, %p1258_p8 }
  0x28   : > { %1268 = shalt.err (!%p1265_p12)
}
  0x29   : > { %s1460_s26 = smov 128   ;;  %s1461_s27 = smov 8  }
  0x2a   : > { %1139 = dma.hbm_to_vmem [thread:$0]  (!%p1564_p6), %s1777_s3, 384, %s1560_s18, [#allocation12], %s1460_s26, %s1460_s26, %s1461_s27  }
  0x2b   : > { %s1280_s13 = scalar_lea.vmem %s1568_s21, 512  ;;  %p1288_p5 = scmp.lt.s32.totalorder %s1568_s21, %s1568_s21 }
  0x2c   : > { %p1281_p13 = scmp.ne.s32.totalorder %s1568_s21, %s1280_s13  ;;  %p1289_p8 = scmp.lt.s32.totalorder %s1280_s13, %s1280_s13 }
  0x2e   : > { %p1283_p0 = pnand %p1281_p13, %p1219_p7  ;;  %p1290_p9 = por %p1289_p8, %p1288_p5 }
  0x30   : > { %p1284_p2 = pneg %p1283_p0 }
  0x32   : > { %p1291_p10 = pnand %p1290_p9, %p1284_p2 }
  0x34   : > { %1294 = shalt.err (!%p1291_p10)
}
  0x35   : > { %1142 = dma.hbm_to_vmem [thread:$0]  (!%p1564_p6), %s1779_s5, 512, %s1568_s21, [#allocation12], %s1460_s26, %s1460_s26, %s1461_s27  }
  0x36   : > { %s1462_s18 = smov [#allocation14]  }
  0x37   : > { %s308_s20 = sshll.u32 %s1462_s18, 4  ;;  %s309_s20 = int_to_ptr.vmem [resolvable:$true] %s308_s20 }
  0x38   : > { %s1306_s22 = scalar_lea.vmem %s309_s20, 512  ;;  %p1314_p0 = scmp.lt.s32.totalorder %s309_s20, %s309_s20 }
  0x39   : > { %p1307_p11 = scmp.ne.s32.totalorder %s309_s20, %s1306_s22  ;;  %p1315_p2 = scmp.lt.s32.totalorder %s1306_s22, %s1306_s22 }
  0x3b   : > { %p1309_p12 = pnand %p1307_p11, %p1219_p7  ;;  %p1316_p5 = por %p1315_p2, %p1314_p0 }
  0x3d   : > { %p1310_p13 = pneg %p1309_p12 }
  0x3f   : > { %p1317_p8 = pnand %p1316_p5, %p1310_p13 }
  0x41   : > { %1320 = shalt.err (!%p1317_p8)
}
  0x42   : > { %1145 = dma.hbm_to_vmem [thread:$0]  (!%p1564_p6), %s1781_s7, 512, %s309_s20, [#allocation15], %s1460_s26, %s1460_s26, %s1461_s27  }
  0x43   : > { %s1615_s21 = sadd.s32 1, %s1455_s12   ;;  %s35_s19 = sadd.s32 1, %s1451_s11 }
  0x44   : > { %s32_s25 = ssub.s32 %s1455_s12, %s1615_s21  ;;  %p42_p7 = scmp.ne.s32.totalorder %s1451_s11, %s1447_s10 }
  0x45   : > { %p33_p9 = scmp.eq.s32.totalorder %s32_s25, 0  ;;  %p43_p10 = scmp.eq.s32.totalorder %s1455_s12, 0 }
  0x46   : > { %p48_p11 = scmp.ne.s32.totalorder %s1447_s10, %s1443_s30  ;;  %p1157_p12 = scmp.lt.s32.totalorder %s1455_s12, 3 }
  0x47   : > { %s1627_s28 = scalar_select %p33_p9, %s1451_s11, %s35_s19  }
  0x48   : > { %p44_p13 = por %p43_p10, %p42_p7  ;;  %p1631_p0 = por %p1784_p1, %p48_p11 }
  0x49   : > { %s1636_s26 = sand.u32 1, %s1451_s11   ;;  %s1033_s27 = sshll.u32 %s1455_s12, 4 }
  0x4a   : > { %s1792_s29 = scalar_select %p1631_p0, 1, 0 }
  0x4b   : > { %s1793_s0 = sld [smem:[#allocation23_spill]]  ;;  %s328_s30 = scalar_lea.vmem [#allocation5], %s1636_s26 }
  0x4c   : > { %s335_s18 = sshll.u32 %s328_s30, 4  ;;  %p1647_p6 = pnand %p1157_p12, %p44_p13  ;;  %s1645_s18 = int_to_ptr.vmem [resolvable:$true] %s335_s18 }
  0x4d   : > { %s326_s24 = scalar_lea.sflag [#allocation6], %s1636_s26 }
  0x4e   : > { %p1323_p5 = pneg %p1647_p6 }
  0x51   : > { %s1642_s17 = scalar_lea.hbm %s1793_s0, %s1033_s27  ;;  %s1326_s13 = scalar_lea.hbm %s1793_s0, 48 }
  0x52   : > { %s1321_s19 = scalar_lea.hbm %s1642_s17, 16  ;;  %p1327_p9 = scmp.lt.s32.totalorder %s1642_s17, %s1793_s0 }
  0x53   : > { %p1322_p2 = scmp.ne.s32.totalorder %s1642_s17, %s1321_s19  ;;  %p1328_p10 = scmp.lt.s32.totalorder %s1326_s13, %s1321_s19 }
  0x55   : > { %p1324_p8 = pnand %p1323_p5, %p1322_p2  ;;  %p1329_p11 = por %p1328_p10, %p1327_p9 }
  0x57   : > { %p1325_p7 = pneg %p1324_p8 }
  0x59   : > { %p1330_p12 = pnand %p1329_p11, %p1325_p7 }
  0x5b   : > { %1333 = shalt.err (!%p1330_p12)
}
  0x5c   : > { %s1334_s22 = scalar_lea.vmem %s1645_s18, 16  ;;  %s1463_s25 = smov [#allocation5]  }
  0x5d   : > { %p1335_p13 = scmp.ne.s32.totalorder %s1645_s18, %s1334_s22  ;;  %s1339_s27 = sshll.u32 %s1463_s25, 4  ;;  %s1340_s27 = int_to_ptr.vmem [resolvable:$false] %s1339_s27 }
  0x5e   : > { %s1341_s23 = scalar_lea.vmem %s1340_s27, 32  ;;  %p1342_p3 = scmp.lt.s32.totalorder %s1645_s18, %s1340_s27 }
  0x5f   : > { %p1337_p2 = pnand %p1335_p13, %p1323_p5  ;;  %p1343_p1 = scmp.lt.s32.totalorder %s1341_s23, %s1334_s22 }
  0x61   : > { %p1338_p8 = pneg %p1337_p2  ;;  %p1344_p0 = por %p1343_p1, %p1342_p3 }
  0x63   : > { %p1345_p9 = pnand %p1344_p0, %p1338_p8 }
  0x65   : > { %1348 = shalt.err (!%p1345_p9)
}
  0x66   : > { %1149 = dma.hbm_to_vmem [thread:$0]  (!%p1647_p6), %s1642_s17, 16, %s1645_s18, %s326_s24  }
  0x67   : > { %s1035_s19 = sshll.u32 %s1455_s12, 7  ;;  %s1795_s25 = sshll.u32 %s1636_s26, 3 }
  0x68   : > { %s1682_s30 = scalar_lea.hbm %s1775_s1, %s1035_s19  ;;  %s346_s22 = scalar_lea.vmem [#allocation8], %s1795_s25 }
  0x69   : > { %s353_s23 = sshll.u32 %s346_s22, 4  ;;  %s1796_s27 = sand.u32 1, %s1455_s12   ;;  %s354_s23 = int_to_ptr.vmem [resolvable:$true] %s353_s23 }
  0x6a   : > { %s343_s0 = scalar_lea.sflag [#allocation9], %s1796_s27  ;;  %s1349_s2 = scalar_lea.hbm %s1682_s30, 128 }
  0x6b   : > { %p1350_p1 = scmp.ne.s32.totalorder %s1682_s30, %s1349_s2  ;;  %s1354_s24 = scalar_lea.hbm %s1775_s1, 384 }
  0x6c   : > { %p1355_p7 = scmp.lt.s32.totalorder %s1682_s30, %s1775_s1  ;;  %p1356_p10 = scmp.lt.s32.totalorder %s1354_s24, %s1349_s2 }
  0x6d   : > { %p1352_p3 = pnand %p1350_p1, %p1323_p5 }
  0x6e   : > { %p1357_p11 = por %p1356_p10, %p1355_p7 }
  0x6f   : > { %p1353_p0 = pneg %p1352_p3 }
  0x71   : > { %p1358_p12 = pnand %p1357_p11, %p1353_p0 }
  0x73   : > { %1361 = shalt.err (!%p1358_p12)
}
  0x74   : > { %s1362_s12 = scalar_lea.vmem %s354_s23, 128  ;;  %s1464_s13 = smov [#allocation8]  }
  0x75   : > { %p1363_p13 = scmp.ne.s32.totalorder %s354_s23, %s1362_s12  ;;  %s1367_s14 = sshll.u32 %s1464_s13, 4  ;;  %s1368_s14 = int_to_ptr.vmem [resolvable:$false] %s1367_s14 }
  0x76   : > { %s1369_s25 = scalar_lea.vmem %s1368_s14, 256  ;;  %p1370_p9 = scmp.lt.s32.totalorder %s354_s23, %s1368_s14 }
  0x77   : > { %p1365_p2 = pnand %p1363_p13, %p1323_p5  ;;  %p1371_p1 = scmp.lt.s32.totalorder %s1369_s25, %s1362_s12 }
  0x79   : > { %p1366_p8 = pneg %p1365_p2  ;;  %p1372_p3 = por %p1371_p1, %p1370_p9 }
  0x7b   : > { %p1373_p4 = pnand %p1372_p3, %p1366_p8 }
  0x7d   : > { %1376 = shalt.err (!%p1373_p4)
}
  0x7e   : > { %1152 = dma.hbm_to_vmem [thread:$0]  (!%p1647_p6), %s1682_s30, 128, %s354_s23, %s343_s0  }
  0x7f   : > { %p1797_p0 = scmp.ne.s32.totalorder %s1789_s16, 0 }
  0x80   : > { %s364_s2 = sand.u32 (!%p1797_p0), 1, %s1447_s10   ;;  %p1798_p5 = scmp.ne.s32.totalorder (!%p1797_p0), %s1792_s29, 0 }
  0x81   : > { %362 = sbr.rel (%p1797_p0) target bundleno = 1228 (0x4cc), region = 56  ;;  %s365_s22 = scalar_lea.sflag (!%p1797_p0), [#allocation6], %s364_s2 }
  0x82   : > { %s367_s27 = scalar_lea.vmem (!%p1797_p0), [#allocation5], %s364_s2 }
  0x86   : > { %1418 = dma.done.wait (%p1798_p5), %s365_s22, 16  }
  0x87   : > { %1420 = vsyncadd (%p1798_p5), %s365_s22, 4294967280  ;;  %s372_s17 = sand.u32 1, %s1548_s15   ;;  %s1037_s18 = sshll.u32 %s364_s2, 3 }
  0x88   : > { %s373_s20 = scalar_lea.sflag [#allocation9], %s372_s17  ;;  %s376_s24 = scalar_lea.vmem [#allocation8], %s1037_s18 }
  0x89   : > { %1422 = dma.done.wait (%p1798_p5), %s373_s20, 128  }
  0x8a   : > { %1424 = vsyncadd (%p1798_p5), %s373_s20, 4294967168  ;;  %p1799_p4 = scmp.eq.s32.totalorder %s1548_s15, 0 }
  0x8c   : > { %1426 = dma.done.wait (%p1799_p4), [#allocation9], 64   ;;  %p1800_p6 = pmov %p1799_p4 }
  0x8d   : > { %p1801_p7 = pmov %p1799_p4 }
  0x8e   : > { %1428 = vsyncadd (%p1800_p6), [#allocation9], 4294967232 }
  0x8f   : > { %1430 = dma.done.wait (%p1801_p7), [#allocation12], 896   ;;  %p1802_p10 = pmov %p1799_p4 }
  0x90   : > { %p1803_p11 = pmov %p1799_p4 }
  0x91   : > { %1432 = vsyncadd (%p1802_p10), [#allocation12], 4294966400 }
  0x92   : > { %1434 = dma.done.wait (%p1803_p11), [#allocation15], 512   ;;  %p1804_p12 = pmov %p1799_p4 }
  0x93   : > { %p1805_p13 = scmp.ne.s32.totalorder %s1548_s15, 0 }
  0x94   : > { %1436 = vsyncadd (%p1804_p12), [#allocation15], 4294966784 }
  0x95   : > { %429 = sbr.rel (%p1805_p13) target bundleno = 158 (0x9e), region = 84 }
  0x9a   : > { %vm430_vm0 = vcmask 60416   ;;  %vm432_vm1 = vcmask 3072   ;;  %vm434_vm2 = vcmask 31744   ;;  %v1465_v0 = vmov 0.0  }
  0x9b   : > { %431 = vst.msk [vmem:[#allocation2] sm:$0xf] %vm430_vm0, %v1465_v0  ;;  %v1466_v1 = vmov -inf  }
  0x9c   : > { %433 = vst.msk [vmem:[#allocation3] sm:$0xf] %vm432_vm1, %v1465_v0 }
  0x9d   : > { %435 = vst.msk [vmem:[#allocation4] sm:$0xff] %vm434_vm2, %v1466_v1 }
  0x9e PF: > { %v437_v2 = vld [vmem:[%s376_s24] sm:$0xff]  ;;  %v438_v4 = vlaneseq  ;;  %v1467_v5 = vmov 0.0   ;;  %vm1468_vm3 = vmmov 0   ;;  %v1469_v7 = vmov 0   ;;  %p1045_p2 = scmp.ne.s32.totalorder %s1548_s15, 2 }
  0x9f   : > { %v436_v3 = vld [vmem:[%s367_s27] sm:$0x1]  ;;  %1073 = vmatprep.subr.mxu0 %v1467_v5  ;;  %1075 = vmatprep.mubr.msk.f32.mxu0 %vm1468_vm3, %v1467_v5  ;;  %vm522_vm8 = vcmask 1043456   ;;  %v1470_v18 = vmov 1.0   ;;  %vm541_vm14 = vcmask 7168   ;;  %vm527_vm15 = vcmask 3072  }
  0xa0   : > { %vm529_vm4 = vcmp.eq.s32.totalorder %v436_v3, 0  ;;  %vm543_vm5 = vcmp.eq.s32.totalorder %v436_v3, 1  ;;  %vm557_vm6 = vcmp.eq.s32.totalorder %v436_v3, 2  ;;  %1074 = vmatpush3.xpose.msra.mxu0 %v437_v2  ;;  %v439_v6 = vshrl.u32 %v438_v4, 7  ;;  %s1474_s0 = smov (!%p1045_p2), 12   ;;  %s1475_s16 = smov (!%p1045_p2), 4  }
  0xa1   : > { %v530_v8 = vsel %vm529_vm4, 1, %v1469_v7  ;;  %v544_v9 = vsel %vm543_vm5, 1, %v1469_v7  ;;  %v558_v10 = vsel %vm557_vm6, 1, %v1469_v7  ;;  %vm571_vm7 = vcmp.eq.s32.totalorder %v436_v3, 3 }
  0xa2   : > { %v442_v11 = vsub.s32 0, %v439_v6  ;;  %v572_v12 = vsel %vm571_vm7, 1, %v1469_v7  ;;  %vm555_vm0 = vcmask 15368   ;;  %vm569_vm1 = vcmask 23568   ;;  %v447_v40 = vld [vmem:[#allocation2] sm:$0xf] }
  0xa3   : > { %v521_v29 = vld [vmem:[#allocation3] sm:$0xf]  ;;  %vm583_vm2 = vcmask 31768   ;;  %vm519_vm3 = vcmask 60416  }
  0xa4   : > { %v443_v13 = vrot.slane %v436_v3, %v442_v11  ;;  %v534_v14 = vrot.slane %v530_v8, %v442_v11  ;;  %v548_v15 = vrot.slane %v544_v9, %v442_v11  ;;  %v562_v16 = vrot.slane %v558_v10, %v442_v11  ;;  %v539_v25 = vld [vmem:[#allocation4] sm:$0xff] }
  0xa5   : > { %v576_v17 = vrot.slane %v572_v12, %v442_v11 }
  0xa6   : > { %vm444_vm9 = vcmp.eq.s32.totalorder %v443_v13, %v439_v6  ;;  %vm535_vm10 = vcmp.eq.s32.totalorder %v534_v14, 1  ;;  %vm549_vm11 = vcmp.eq.s32.totalorder %v548_v15, 1  ;;  %vm563_vm12 = vcmp.eq.s32.totalorder %v562_v16, 1 }
  0xa7   : > { %1076 = vmatmul.mubr.msk.f32.vlgmr.msra.gmra.mxu0 %vm444_vm9, %v1470_v18  ;;  %v536_v19 = vsel %vm535_vm10, %v437_v2, -inf  ;;  %v564_v20 = vsel %vm563_vm12, %v437_v2, -inf  ;;  %v1043_v21 = vsel %vm444_vm9, 1.0, %v1467_v5  ;;  %v550_v22 = vsel %vm549_vm11, %v437_v2, -inf }
  0xa8   : > { %537 = vmax.xlane.f32.xlu0 %v536_v19  ;;  %565 = vmax.xlane.f32.xlu1 %v564_v20  ;;  %v523_v23 = vsel %vm522_vm8, %v1043_v21, 0.0  ;;  %vm577_vm13 = vcmp.eq.s32.totalorder %v576_v17, 1 }
  0xa9   : > { %v578_v24 = vsel %vm577_vm13, %v437_v2, -inf }
  0xac   : > { %551 = vmax.xlane.f32.xlu0 %v550_v22  ;;  %524 = vadd.xlane.f32.xlu1 %v523_v23 }
  0xb0   : > { %579 = vmax.xlane.f32.xlu0 %v578_v24 }
 0x131   : > { %v538_v26 = vpop.xlane.xlu0 %537  ;;  %v566_v27 = vpop.xlane.xlu1 %565 }
 0x132   : > { %v540_v28 = vmax.f32 %v539_v25, %v538_v26 }
 0x134   : > { %542 = vst.msk [vmem:[#allocation4] sm:$0xff] %vm541_vm14, %v540_v28 }
 0x135   : > { %v525_v30 = vpop.xlane.xlu1 %524  ;;  %v552_v32 = vpop.xlane.xlu0 %551 }
 0x136   : > { %v526_v31 = vadd.f32 %v525_v30, %v521_v29 }
 0x138   : > { %528 = vst.msk [vmem:[#allocation3] sm:$0xf] %vm527_vm15, %v526_v31 }
 0x139   : > { %v580_v37 = vpop.xlane.xlu0 %579 }
 0x13b   : > { %v553_v33 = vld [vmem:[#allocation4] sm:$0xff] }
 0x13c   : > { %v554_v34 = vmax.f32 %v553_v33, %v552_v32 }
 0x13e   : > { %556 = vst.msk [vmem:[#allocation4] sm:$0xff] %vm555_vm0, %v554_v34 }
 0x145   : > { %v567_v35 = vld [vmem:[#allocation4] sm:$0xff] }
 0x146   : > { %v568_v36 = vmax.f32 %v567_v35, %v566_v27 }
 0x148   : > { %570 = vst.msk [vmem:[#allocation4] sm:$0xff] %vm569_vm1, %v568_v36 }
 0x14f   : > { %v581_v38 = vld [vmem:[#allocation4] sm:$0xff] }
 0x150   : > { %v582_v39 = vmax.f32 %v581_v38, %v580_v37 }
 0x152   : > { %584 = vst.msk [vmem:[#allocation4] sm:$0xff] %vm583_vm2, %v582_v39 }
 0x166   : > { %588 = sbr.rel (%p1045_p2) target bundleno = 1213 (0x4bd), region = 88 }
 0x167   : > { %v514_v41 = vpop.f32.mrf.mxu0 }
 0x168   : > { %v518_v42 = vadd.f32 %v514_v41, %v447_v40 }
 0x169   : > { %v1077_v43 = vpop.f32.mrf.mxu0 }
 0x16a   : > { %520 = vst.msk [vmem:[#allocation2] sm:$0xf] %vm519_vm3, %v518_v42 }
 0x16b   : > { %v589_v44 = vld [vmem:[#allocation3] sm:$0xf]  ;;  %v600_v45 = vld [vmem:[#allocation4] sm:$0xff]  ;;  %v1471_v46 = vmov 0   ;;  %v654_v49 = vld [vmem:[#allocation11 + $0x10] sm:$0xf] }
 0x16c   : > { %1214 = vset.pattern.permute.xlu0 %v1471_v46  ;;  %vm599_vm4 = vcmp.gt.f32.partialorder %v589_v44, 0.0  ;;  %v591_v47 = vmax.f32 %v589_v44, 1.0  ;;  %601 = vxpose.xlu1.b32.start.end [1/1] (short) (narrow) %v600_v45, 8  ;;  %v1472_v50 = vmov 0.0   ;;  %v653_v51 = vld [vmem:[#allocation11 + $0x8] sm:$0xff]  ;;  %v652_v55 = vld [vmem:[#allocation11] sm:$0xff] }
 0x16d   : > { %v633_v48 = vsel %vm599_vm4, 1, %v1471_v46  ;;  %1078 = vmatprep.subr.mxu0 %v1472_v50  ;;  %1087 = vmatprep.subr.mxu1 %v1472_v50  ;;  %vm1473_vm6 = vmmov 0   ;;  %v743_v57 = vld [vmem:[#allocation13 + $0x18] sm:$0xff]  ;;  %v639_v61 = vld [vmem:[#allocation10] sm:$0xf]  ;;  %vm648_vm7 = vcmask 31744  }
 0x16e   : > { %594 = vperm.xlu0 %1214, %v591_v47   ;;  %1079 = vmatpush3.msk.msra.mxu0 %vm522_vm8, %v654_v49  ;;  %vm650_vm8 = vcmask 97280   ;;  %vm662_vm9 = vcmask 162816   ;;  %v742_v2 = vld [vmem:[#allocation13 + $0x10] sm:$0xff]  ;;  %v741_v3 = vld [vmem:[#allocation13 + $0x8] sm:$0xff]  ;;  %v740_v4 = vld [vmem:[#allocation13] sm:$0xff]  ;;  %vm751_vm10 = vcmask 261120  }
 0x16f   : > { %1080 = vmatprep.subr.mxu0 %v1472_v50  ;;  %1084 = vmatprep.mubr.msk.f32.mxu0 %vm1473_vm6, %v1472_v50  ;;  %v829_v5 = vld [vmem:[#allocation14 + $0x18] sm:$0xff]  ;;  %v1046_v6 = vld [vmem:[%s1778_s4] ss:$0 sm:$0xff]  ;;  %v828_v11 = vld [vmem:[#allocation14 + $0x10] sm:$0xff] }
 0x170   : > { %1081 = vmatpush3.msra.mxu0 %v653_v51  ;;  %1095 = vmatprep.mubr.msk.f32.mxu1 %vm1473_vm6, %v1472_v50  ;;  %v827_v12 = vld [vmem:[#allocation14 + $0x8] sm:$0xff]  ;;  %v826_v13 = vld [vmem:[#allocation14] sm:$0xff] }
 0x171   : > { %1082 = vmatprep.subr.mxu0 %v1472_v50  ;;  %1088 = vmatpush3.msra.mxu1 %v743_v57  ;;  %v590_v58 = vld [vmem:[#allocation2] sm:$0xf] }
 0x172   : > { %635 = vperm.xlu0 %1214, %v633_v48   ;;  %1083 = vmatpush3.msra.mxu0 %v652_v55  ;;  %v1049_v14 = vld [vmem:[%s1780_s6] ss:$0 sm:$0xff] }
 0x173   : > { %1098 = vmatprep.subr.mxu0 %v1472_v50  ;;  %1089 = vmatprep.subr.mxu1 %v1472_v50  ;;  %v1051_v19 = vld [vmem:[%s1782_s8] ss:$0 sm:$0xff] }
 0x174   : > { %1090 = vmatpush3.msra.mxu1 %v742_v2 }
 0x175   : > { %1091 = vmatprep.subr.mxu1 %v1472_v50 }
 0x176   : > { %1092 = vmatpush3.msra.mxu1 %v741_v3 }
 0x177   : > { %1093 = vmatprep.subr.mxu1 %v1472_v50 }
 0x178   : > { %1094 = vmatpush3.msra.mxu1 %v740_v4 }
 0x1e8   : > { %v617_v53 = vpop.trf.xlu1 }
 0x1e9   : > { %v595_v52 = vpop.permute.xlu0 %594 }
 0x1ea   : > { %1215 = vrcp.f32 %v595_v52 }
 0x1ed   : > { %v636_v54 = vpop.permute.xlu0 %635 }
 0x1ee   : > { %vm637_vm5 = vcmp.eq.s32.totalorder %v636_v54, 1 }
 0x1ef   : > { %v638_v56 = vsel %vm637_vm5, %v617_v53, 0.0 }
 0x1f0   : > { %645 = vrot.lane.b32.xlu0 %v638_v56, %s1474_s0 }
 0x1f7   : > { %v1216_v59 = vpop.eup %1215 }
 0x1f8   : > { %v598_v60 = vmul.f32 %v1216_v59, %v590_v58 }
 0x1fa   : > { %641 = vrot.lane.b32.xlu1 %v598_v60, %s1475_s16 }
 0x262   : > { %v646_v63 = vpop.permute.xlu0 %645 }
 0x26c   : > { %v642_v62 = vpop.permute.xlu1 %641 }
 0x26d   : > { %v649_v0 = vsel %vm648_vm7, %v639_v61, %v642_v62 }
 0x26e   : > { %v651_v1 = vsel %vm650_vm8, %v649_v0, %v646_v63 }
 0x26f   : > { %1085 = vmatmul.mubr.msk.f32.vlgmr.msra.gmra.mxu0 %vm662_vm9, %v651_v1 }
 0x270   : > { %1106 = vmatprep.mubr.msk.f32.mxu0 %vm1473_vm6, %v1472_v50  ;;  %1099 = vmatpush3.msra.mxu0 %v829_v5 }
 0x271   : > { %1100 = vmatprep.subr.mxu0 %v1472_v50 }
 0x272   : > { %1101 = vmatpush3.msra.mxu0 %v828_v11 }
 0x273   : > { %1102 = vmatprep.subr.mxu0 %v1472_v50 }
 0x274   : > { %1103 = vmatpush3.msra.mxu0 %v827_v12 }
 0x275   : > { %1104 = vmatprep.subr.mxu0 %v1472_v50 }
 0x276   : > { %1105 = vmatpush3.msra.mxu0 %v826_v13 }
 0x32f   : > { %v735_v7 = vpop.f32.mrf.mxu0 }
 0x330   : > { %v736_v8 = vadd.f32 %v1046_v6, %v735_v7 }
 0x331   : > { %v1086_v9 = vpop.f32.mrf.mxu0 }
 0x332   : > { %v739_v10 = vmax.f32 %v736_v8, 0.0 }
 0x334   : > { %1096 = vmatmul.mubr.msk.f32.vlgmr.msra.gmra.mxu1 %vm751_vm10, %v739_v10 }
 0x3f4   : > { %v821_v15 = vpop.f32.mrf.mxu1 }
 0x3f5   : > { %v822_v16 = vadd.f32 %v1049_v14, %v821_v15 }
 0x3f6   : > { %v1097_v17 = vpop.f32.mrf.mxu1 }
 0x3f7   : > { %v825_v18 = vmax.f32 %v822_v16, 0.0 }
 0x3f9   : > { %1107 = vmatmul.mubr.msk.f32.vlgmr.msra.gmra.mxu0 %vm751_vm10, %v825_v18 }
 0x4b9   : > { %v906_v20 = vpop.f32.mrf.mxu0 }
 0x4ba   : > { %v907_v21 = vadd.f32 %v1051_v19, %v906_v20 }
 0x4bb   : > { %v1108_v22 = vpop.f32.mrf.mxu0 }
 0x4bc   : > { %910 = vst [vmem:[#allocation16] sm:$0xf] %v907_v21 }
 0x4bd PF: > { %p1162_p8 = scmp.eq.s32.totalorder %s1548_s15, 2  ;;  %s1476_s13 = smov [#allocation16]  }
 0x4be   : > { %s918_s14 = sshll.u32 %s1476_s13, 4  ;;  %s919_s14 = int_to_ptr.vmem [resolvable:$true] %s918_s14 }
 0x4bf   : > { %s1377_s25 = scalar_lea.vmem %s919_s14, 64  ;;  %p1384_p0 = scmp.lt.s32.totalorder %s919_s14, %s919_s14 }
 0x4c0   : > { %p1378_p9 = scmp.ne.s32.totalorder %s919_s14, %s1377_s25  ;;  %p1385_p5 = scmp.lt.s32.totalorder %s1377_s25, %s1377_s25 }
 0x4c2   : > { %p1379_p1 = pnand %p1378_p9, %p1162_p8  ;;  %p1386_p4 = por %p1385_p5, %p1384_p0 }
 0x4c4   : > { %p1380_p3 = pneg %p1379_p1 }
 0x4c6   : > { %p1387_p6 = pnand %p1386_p4, %p1380_p3 }
 0x4c8   : > { %1390 = shalt.err (!%p1387_p6)
}
 0x4c9   : > { %1130 = dma.vmem_to_hbm [thread:$0]  (%p1162_p8), %s919_s14, 64, %s1783_s9, [#allocation7]  }
 0x4ca   : > { %1438 = dma.done.wait (%p1162_p8), [#allocation7], 64  }
 0x4cb   : > { %1440 = vsyncadd (%p1162_p8), [#allocation7], 4294967232 }
 0x4cc PF: > { %p25_p7 = scmp.ge.s32.totalorder %s1615_s21, 5   ;;  %s1806_s30 = smov %s1447_s10 }
 0x4cd   : > { %s1807_s10 = smov %s1451_s11  ;;  %s1808_s11 = smov %s1627_s28 }
 0x4ce   : > { %s1809_s12 = smov %s1615_s21  ;;  %27 = sbr.rel (!%p25_p7) target bundleno = 11 (0xb), region = 130 }
 0x4d3   :  { %931 = vsyncpa [#allocation6], 1 }
 0x4d4   :  { %933 = vsyncpa [#allocation6 + $0x1], 1 }
 0x4d5   :  { %934 = vsyncpa [#allocation9], 1 }
 0x4d6   :  { %936 = vsyncpa [#allocation9 + $0x1], 1 }
 0x4d7   :  { %937 = vsyncpa [#allocation12], 1 }
 0x4d8   :  { %938 = vsyncpa [#allocation15], 1 }
 0x4d9   :  { %939 = vsyncpa [#allocation7], 1 }
 0x4da   :  { %941 = vsyncpa [#allocation7 + $0x1], 1 }

</bundles_post_ra>
